<compile_context>
chip_gen: v5e
topology: v5e:2x2
jax: 0.10.0
libtpu: 0.0.40
codegen_flags: <defaults>
</compile_context>

<pallas_src>
import jax
import jax.numpy as jnp
import numpy as np
from jax import lax
from jax.experimental import pallas as pl
from jax.experimental.pallas import tpu as pltpu


_SUBLANE = 8
_LANE = 128


def _round_up(x, m):
    return (x + m - 1) // m * m


def elman_rnn_kernel(x_ref, wih_ref, whh_ref, b1_ref, w23_ref, b23_ref,
                     out_ref, h_carry, h_all):
    """One (batch_block, time_chunk) tile of the Elman RNN + fused output projection.

    x_ref  : (Tc, Bb, Ep)  embedded inputs (time-major, padded)
    wih_ref: (Ep, Hp)      input->hidden block of Elman.lin1
    whh_ref: (Hp, Hp)      hidden->hidden block of Elman.lin1
    b1_ref : (1, Hp)       Elman.lin1 bias
    w23_ref: (Hp, Cp)      folded  w2 @ w3
    b23_ref: (1, Cp)       folded  b2 @ w3 + b3
    out_ref: (Tc, Bb, Cp)  per-step class logits (padded)
    h_carry: (Bb, Hp)      VMEM scratch, hidden state carried across time chunks
    h_all  : (Tc, Bb, Hp)  VMEM scratch, pre-activations then hidden states for the chunk
    """
    Tc, Bb, Ep = x_ref.shape
    Hp = whh_ref.shape[0]

    # Reset the recurrent carry at the start of each batch-block's time sweep.
    @pl.when(pl.program_id(1) == 0)
    def _():
        h_carry[...] = jnp.zeros_like(h_carry)

    # Hoisted, batched input projection for the whole chunk: one big MXU op.
    x_flat = x_ref[...].reshape(Tc * Bb, Ep)
    pre = jnp.dot(x_flat, wih_ref[...], preferred_element_type=jnp.float32) + b1_ref[...]
    h_all[...] = pre.reshape(Tc, Bb, Hp)

    # Hoist weight load out of the loop (avoid per-iteration reloads/broadcasts).
    whh = whh_ref[...]

    def step(t, h):
        h_new = jax.nn.sigmoid(
            h_all[t] + jnp.dot(h, whh, preferred_element_type=jnp.float32))
        h_all[t] = h_new                       # overwrite pre-activation with hidden state
        return h_new

    # Unrolled so the LLO scheduler can overlap MXU push of step t+1 with the EUP sigmoid of t.
    h_carry[...] = lax.fori_loop(0, Tc, step, h_carry[...], unroll=True)

    # Hoisted, batched fused output projection + one lane-dense store of the whole chunk.
    logits = (jnp.dot(h_all[...].reshape(Tc * Bb, Hp), w23_ref[...],
                      preferred_element_type=jnp.float32) + b23_ref[...])
    out_ref[...] = logits.reshape(Tc, Bb, -1).astype(out_ref.dtype)


def rnn_forward(tokens, params, *, time_chunk=32):
    """tokens: (B, T) int32.  Returns logits (B, T, num_classes) float32."""
    emb = params["emb"]                                   # (vocab, E), pad row already zero
    wih, whh, b1 = params["wih"], params["whh"], params["b1"]
    w2, b2, w3, b3 = params["w2"], params["b2"], params["w3"], params["b3"]

    B, T = tokens.shape
    E = emb.shape[1]
    H = whh.shape[0]
    C = w3.shape[1]

    # Fold Elman.lin2 and RNN.linear2 (no nonlinearity between them): one projection per step.
    w23 = jnp.dot(w2, w3, preferred_element_type=jnp.float32)        # (H, C)
    b23 = jnp.dot(b2, w3, preferred_element_type=jnp.float32) + b3   # (1, C)

    # Hardware-friendly padded sizes (lane=128, sublane=8 for f32).
    Ep, Hp, Cp = _round_up(E, _LANE), _round_up(H, _LANE), _round_up(C, _LANE)
    Bb = _SUBLANE
    Bp = _round_up(B, Bb)
    Tc = int(min(T, time_chunk))
    Tp = _round_up(T, Tc)
    nb, nt = Bp // Bb, Tp // Tc

    # Zero-pad parameters; padded rows/cols are zero so padded hidden/class lanes stay inert
    # (padded hidden units saturate at sigmoid(0)=0.5 but feed through zero weight rows).
    wih_p = jnp.zeros((Ep, Hp), jnp.float32).at[:E, :H].set(wih)
    whh_p = jnp.zeros((Hp, Hp), jnp.float32).at[:H, :H].set(whh)
    b1_p = jnp.zeros((1, Hp), jnp.float32).at[:, :H].set(b1)
    w23_p = jnp.zeros((Hp, Cp), jnp.float32).at[:H, :C].set(w23)
    b23_p = jnp.zeros((1, Cp), jnp.float32).at[:, :C].set(b23)

    # Time-major embedding gather directly (no separate transpose pass); padded token slots use
    # index 0 (always valid) — padded batch rows / trailing time steps are sliced off below and
    # cannot affect real outputs (recurrence only flows forward in time).
    emb_p = jnp.zeros((emb.shape[0], Ep), jnp.float32).at[:, :E].set(emb)
    tok_p = jnp.zeros((Bp, Tp), tokens.dtype).at[:B, :T].set(tokens)
    x_tm = emb_p[tok_p.T]                                  # (Tp, Bp, Ep)

    grid_spec = pltpu.PrefetchScalarGridSpec(
        num_scalar_prefetch=0,
        grid=(nb, nt),
        in_specs=[
            pl.BlockSpec((Tc, Bb, Ep), lambda b, t: (t, b, 0)),   # x chunk
            pl.BlockSpec((Ep, Hp), lambda b, t: (0, 0)),          # wih
            pl.BlockSpec((Hp, Hp), lambda b, t: (0, 0)),          # whh
            pl.BlockSpec((1, Hp), lambda b, t: (0, 0)),           # b1
            pl.BlockSpec((Hp, Cp), lambda b, t: (0, 0)),          # w23 (folded)
            pl.BlockSpec((1, Cp), lambda b, t: (0, 0)),           # b23 (folded)
        ],
        out_specs=pl.BlockSpec((Tc, Bb, Cp), lambda b, t: (t, b, 0)),
        scratch_shapes=[
            pltpu.VMEM((Bb, Hp), jnp.float32),       # hidden-state carry across time chunks
            pltpu.VMEM((Tc, Bb, Hp), jnp.float32),   # per-chunk pre-activations / hidden states
        ],
    )

    out_tm = pl.pallas_call(
        elman_rnn_kernel,
        out_shape=jax.ShapeDtypeStruct((Tp, Bp, Cp), jnp.float32),
        grid_spec=grid_spec,
        compiler_params=pltpu.CompilerParams(
            dimension_semantics=("parallel", "arbitrary")),   # batch: megacore; time: serial carry
    )(x_tm, wih_p, whh_p, b1_p, w23_p, b23_p)

    # Slice off padding, return batch-major (B, T, C) like the PyTorch module.
    return jnp.transpose(out_tm[:T, :B, :C], (1, 0, 2))


def ref_forward(tokens, params):
    """Pure-JAX reference matching the PyTorch semantics exactly (unfused projections)."""
    emb = params["emb"][tokens]                            # (B, T, E)
    B, T, _ = emb.shape
    H = params["whh"].shape[0]
    h = jnp.zeros((B, H), jnp.float32)
    outs = []
    for t in range(T):
        pre = emb[:, t] @ params["wih"] + h @ params["whh"] + params["b1"][0]
        h = jax.nn.sigmoid(pre)
        o = h @ params["w2"] + params["b2"][0]
        outs.append(o @ params["w3"] + params["b3"][0])
    return jnp.stack(outs, axis=1)                         # (B, T, C)


def init_params(key, vocab_size, emb_dim, hidden_dim, num_classes, pad_idx):
    ks = jax.random.split(key, 8)
    E, H, C = emb_dim, hidden_dim, num_classes

    def uniform(k, shape, fan_in):
        bound = 1.0 / np.sqrt(fan_in)
        return jax.random.uniform(k, shape, jnp.float32, -bound, bound)

    emb = jax.random.normal(ks[0], (vocab_size, E), jnp.float32)
    emb = emb.at[pad_idx].set(0.0)                         # padding_idx row is zero

    # Elman.lin1: Linear(E + H, H) split into input/hidden blocks (same math as concat).
    wih = uniform(ks[1], (E, H), E + H)
    whh = uniform(ks[2], (H, H), E + H)
    b1 = uniform(ks[3], (1, H), E + H)
    # Elman.lin2: Linear(H, H)
    w2 = uniform(ks[4], (H, H), H)
    b2 = uniform(ks[5], (1, H), H)
    # RNN.linear2: Linear(H, C)
    w3 = uniform(ks[6], (H, C), H)
    b3 = uniform(ks[7], (1, C), H)

    return dict(emb=emb, wih=wih, whh=whh, b1=b1, w2=w2, b2=b2, w3=w3, b3=b3)


if __name__ == "__main__":
    vocab_size, emb_dim, hidden_dim, num_classes, pad_idx = 50, 16, 32, 4, 0
    batch, time = 2, 8

    key = jax.random.PRNGKey(0)
    pkey, tkey = jax.random.split(key)
    params = init_params(pkey, vocab_size, emb_dim, hidden_dim, num_classes, pad_idx)

    tokens = jax.random.randint(tkey, (batch, time), 0, vocab_size, dtype=jnp.int32)

    out = jax.block_until_ready(rnn_forward(tokens, params))      # (B, T, C)
    ref = jax.block_until_ready(ref_forward(tokens, params))

    # Slightly loosened vs 1e-5: the folded W23 = w2 @ w3 projection reassociates the sums.
    np.testing.assert_allclose(np.asarray(out), np.asarray(ref), rtol=2e-5, atol=2e-5)
    assert out.shape == (batch, time, num_classes)
    print("KERNEL_OK")
</pallas_src>

<mosaic_0001>
module attributes {stable_mosaic.version = 11 : i64} {
  func.func @elman_rnn_kernel(%arg0: i32, %arg1: i32, %arg2: memref<8x8x128xf32, #tpu.memory_space<vmem>>, %arg3: memref<128x128xf32, #tpu.memory_space<vmem>>, %arg4: memref<128x128xf32, #tpu.memory_space<vmem>>, %arg5: memref<1x128xf32, #tpu.memory_space<vmem>>, %arg6: memref<128x128xf32, #tpu.memory_space<vmem>>, %arg7: memref<1x128xf32, #tpu.memory_space<vmem>>, %arg8: memref<8x8x128xf32, #tpu.memory_space<vmem>>, %arg9: memref<8x128xf32, #tpu.memory_space<vmem>>, %arg10: memref<8x8x128xf32, #tpu.memory_space<vmem>>) attributes {dimension_semantics = [#tpu.dimension_semantics<parallel>, #tpu.dimension_semantics<arbitrary>], iteration_bounds = array<i64: 1, 1>, scalar_prefetch = 0 : i64, scratch_operands = 2 : i64, tpu.core_type = #tpu.core_type<tc>, window_params = [{transform_indices = @transform_0, window_bounds = array<i64: 8, 8, 128>}, {pipeline_mode = #tpu.pipeline_mode<synchronous>, transform_indices = @transform_1, window_bounds = array<i64: 128, 128>}, {pipeline_mode = #tpu.pipeline_mode<synchronous>, transform_indices = @transform_2, window_bounds = array<i64: 128, 128>}, {pipeline_mode = #tpu.pipeline_mode<synchronous>, transform_indices = @transform_3, window_bounds = array<i64: 1, 128>}, {pipeline_mode = #tpu.pipeline_mode<synchronous>, transform_indices = @transform_4, window_bounds = array<i64: 128, 128>}, {pipeline_mode = #tpu.pipeline_mode<synchronous>, transform_indices = @transform_5, window_bounds = array<i64: 1, 128>}, {transform_indices = @transform_6, window_bounds = array<i64: 8, 8, 128>}]} {
    %c0_i32 = arith.constant 0 : i32
    %0 = arith.cmpi eq, %arg1, %c0_i32 : i32
    %1 = arith.extui %0 : i1 to i32
    %c0_i32_0 = arith.constant 0 : i32
    %2 = arith.cmpi ne, %1, %c0_i32_0 : i32
    scf.if %2 {
      %cst_76 = arith.constant 0.000000e+00 : f32
      %136 = vector.broadcast %cst_76 : f32 to vector<8x128xf32>
      %c0_77 = arith.constant 0 : index
      %c0_78 = arith.constant 0 : index
      %137 = vector.load %arg9[%c0_77, %c0_78] : memref<8x128xf32, #tpu.memory_space<vmem>>, vector<8x128xf32>
      tpu.vector_store %arg9[%c0_77, %c0_78], %136 {strides = array<i32>} : memref<8x128xf32, #tpu.memory_space<vmem>>, vector<8x128xf32>,
    } else {
    }
    %c0 = arith.constant 0 : index
    %c0_1 = arith.constant 0 : index
    %c0_2 = arith.constant 0 : index
    %3 = vector.load %arg2[%c0, %c0_1, %c0_2] : memref<8x8x128xf32, #tpu.memory_space<vmem>>, vector<8x8x128xf32>
    %4 = vector.shape_cast %3 : vector<8x8x128xf32> to vector<64x128xf32>
    %c0_3 = arith.constant 0 : index
    %c0_4 = arith.constant 0 : index
    %5 = vector.load %arg3[%c0_3, %c0_4] : memref<128x128xf32, #tpu.memory_space<vmem>>, vector<128x128xf32>
    %cst = arith.constant dense<0.000000e+00> : vector<64x128xf32>
    %6 = tpu.matmul %4, %5, %cst {dimension_numbers = #tpu.dot_dimension_numbers<[1], [0], [0], [1], [0, 0, 1, 1], [], []>} : vector<64x128xf32>, vector<128x128xf32>, vector<64x128xf32> -> vector<64x128xf32>
    %c0_5 = arith.constant 0 : index
    %c0_6 = arith.constant 0 : index
    %7 = vector.load %arg5[%c0_5, %c0_6] : memref<1x128xf32, #tpu.memory_space<vmem>>, vector<1x128xf32>
    %8 = vector.broadcast %7 : vector<1x128xf32> to vector<64x128xf32>
    %9 = arith.addf %6, %8 : vector<64x128xf32>
    %10 = vector.shape_cast %9 : vector<64x128xf32> to vector<8x8x128xf32>
    %c0_7 = arith.constant 0 : index
    %c0_8 = arith.constant 0 : index
    %c0_9 = arith.constant 0 : index
    %11 = vector.load %arg10[%c0_7, %c0_8, %c0_9] : memref<8x8x128xf32, #tpu.memory_space<vmem>>, vector<8x8x128xf32>
    tpu.vector_store %arg10[%c0_7, %c0_8, %c0_9], %10 {strides = array<i32>} : memref<8x8x128xf32, #tpu.memory_space<vmem>>, vector<8x8x128xf32>,
    %c0_10 = arith.constant 0 : index
    %c0_11 = arith.constant 0 : index
    %12 = vector.load %arg4[%c0_10, %c0_11] : memref<128x128xf32, #tpu.memory_space<vmem>>, vector<128x128xf32>
    %c0_12 = arith.constant 0 : index
    %c0_13 = arith.constant 0 : index
    %13 = vector.load %arg9[%c0_12, %c0_13] : memref<8x128xf32, #tpu.memory_space<vmem>>, vector<8x128xf32>
    %c0_i32_14 = arith.constant 0 : i32
    %14 = arith.index_cast %c0_i32_14 : i32 to index
    %c0_15 = arith.constant 0 : index
    %c0_16 = arith.constant 0 : index
    %15 = vector.load %arg10[%14, %c0_15, %c0_16] : memref<8x8x128xf32, #tpu.memory_space<vmem>>, vector<1x8x128xf32>
    %16 = vector.shape_cast %15 : vector<1x8x128xf32> to vector<8x128xf32>
    %cst_17 = arith.constant dense<0.000000e+00> : vector<8x128xf32>
    %17 = tpu.matmul %13, %12, %cst_17 {dimension_numbers = #tpu.dot_dimension_numbers<[1], [0], [0], [1], [0, 0, 1, 1], [], []>} : vector<8x128xf32>, vector<128x128xf32>, vector<8x128xf32> -> vector<8x128xf32>
    %18 = arith.addf %16, %17 : vector<8x128xf32>
    %19 = arith.negf %18 : vector<8x128xf32>
    %20 = math.exp %19 : vector<8x128xf32>
    %cst_18 = arith.constant 1.000000e+00 : f32
    %21 = vector.broadcast %cst_18 : f32 to vector<8x128xf32>
    %22 = arith.addf %21, %20 : vector<8x128xf32>
    %23 = arith.divf %21, %22 : vector<8x128xf32>
    %24 = arith.index_cast %c0_i32_14 : i32 to index
    %c0_19 = arith.constant 0 : index
    %c0_20 = arith.constant 0 : index
    %25 = vector.load %arg10[%24, %c0_19, %c0_20] : memref<8x8x128xf32, #tpu.memory_space<vmem>>, vector<1x8x128xf32>
    %26 = vector.shape_cast %25 : vector<1x8x128xf32> to vector<8x128xf32>
    %27 = vector.shape_cast %23 : vector<8x128xf32> to vector<1x8x128xf32>
    tpu.vector_store %arg10[%24, %c0_19, %c0_20], %27 {strides = array<i32>} : memref<8x8x128xf32, #tpu.memory_space<vmem>>, vector<1x8x128xf32>,
    %c1_i32 = arith.constant 1 : i32
    %28 = arith.index_cast %c1_i32 : i32 to index
    %c0_21 = arith.constant 0 : index
    %c0_22 = arith.constant 0 : index
    %29 = vector.load %arg10[%28, %c0_21, %c0_22] : memref<8x8x128xf32, #tpu.memory_space<vmem>>, vector<1x8x128xf32>
    %30 = vector.shape_cast %29 : vector<1x8x128xf32> to vector<8x128xf32>
    %cst_23 = arith.constant dense<0.000000e+00> : vector<8x128xf32>
    %31 = tpu.matmul %23, %12, %cst_23 {dimension_numbers = #tpu.dot_dimension_numbers<[1], [0], [0], [1], [0, 0, 1, 1], [], []>} : vector<8x128xf32>, vector<128x128xf32>, vector<8x128xf32> -> vector<8x128xf32>
    %32 = arith.addf %30, %31 : vector<8x128xf32>
    %33 = arith.negf %32 : vector<8x128xf32>
    %34 = math.exp %33 : vector<8x128xf32>
    %cst_24 = arith.constant 1.000000e+00 : f32
    %35 = vector.broadcast %cst_24 : f32 to vector<8x128xf32>
    %36 = arith.addf %35, %34 : vector<8x128xf32>
    %37 = arith.divf %35, %36 : vector<8x128xf32>
    %38 = arith.index_cast %c1_i32 : i32 to index
    %c0_25 = arith.constant 0 : index
    %c0_26 = arith.constant 0 : index
    %39 = vector.load %arg10[%38, %c0_25, %c0_26] : memref<8x8x128xf32, #tpu.memory_space<vmem>>, vector<1x8x128xf32>
    %40 = vector.shape_cast %39 : vector<1x8x128xf32> to vector<8x128xf32>
    %41 = vector.shape_cast %37 : vector<8x128xf32> to vector<1x8x128xf32>
    tpu.vector_store %arg10[%38, %c0_25, %c0_26], %41 {strides = array<i32>} : memref<8x8x128xf32, #tpu.memory_space<vmem>>, vector<1x8x128xf32>,
    %c2_i32 = arith.constant 2 : i32
    %42 = arith.index_cast %c2_i32 : i32 to index
    %c0_27 = arith.constant 0 : index
    %c0_28 = arith.constant 0 : index
    %43 = vector.load %arg10[%42, %c0_27, %c0_28] : memref<8x8x128xf32, #tpu.memory_space<vmem>>, vector<1x8x128xf32>
    %44 = vector.shape_cast %43 : vector<1x8x128xf32> to vector<8x128xf32>
    %cst_29 = arith.constant dense<0.000000e+00> : vector<8x128xf32>
    %45 = tpu.matmul %37, %12, %cst_29 {dimension_numbers = #tpu.dot_dimension_numbers<[1], [0], [0], [1], [0, 0, 1, 1], [], []>} : vector<8x128xf32>, vector<128x128xf32>, vector<8x128xf32> -> vector<8x128xf32>
    %46 = arith.addf %44, %45 : vector<8x128xf32>
    %47 = arith.negf %46 : vector<8x128xf32>
    %48 = math.exp %47 : vector<8x128xf32>
    %cst_30 = arith.constant 1.000000e+00 : f32
    %49 = vector.broadcast %cst_30 : f32 to vector<8x128xf32>
    %50 = arith.addf %49, %48 : vector<8x128xf32>
    %51 = arith.divf %49, %50 : vector<8x128xf32>
    %52 = arith.index_cast %c2_i32 : i32 to index
    %c0_31 = arith.constant 0 : index
    %c0_32 = arith.constant 0 : index
    %53 = vector.load %arg10[%52, %c0_31, %c0_32] : memref<8x8x128xf32, #tpu.memory_space<vmem>>, vector<1x8x128xf32>
    %54 = vector.shape_cast %53 : vector<1x8x128xf32> to vector<8x128xf32>
    %55 = vector.shape_cast %51 : vector<8x128xf32> to vector<1x8x128xf32>
    tpu.vector_store %arg10[%52, %c0_31, %c0_32], %55 {strides = array<i32>} : memref<8x8x128xf32, #tpu.memory_space<vmem>>, vector<1x8x128xf32>,
    %c3_i32 = arith.constant 3 : i32
    %56 = arith.index_cast %c3_i32 : i32 to index
    %c0_33 = arith.constant 0 : index
    %c0_34 = arith.constant 0 : index
    %57 = vector.load %arg10[%56, %c0_33, %c0_34] : memref<8x8x128xf32, #tpu.memory_space<vmem>>, vector<1x8x128xf32>
    %58 = vector.shape_cast %57 : vector<1x8x128xf32> to vector<8x128xf32>
    %cst_35 = arith.constant dense<0.000000e+00> : vector<8x128xf32>
    %59 = tpu.matmul %51, %12, %cst_35 {dimension_numbers = #tpu.dot_dimension_numbers<[1], [0], [0], [1], [0, 0, 1, 1], [], []>} : vector<8x128xf32>, vector<128x128xf32>, vector<8x128xf32> -> vector<8x128xf32>
    %60 = arith.addf %58, %59 : vector<8x128xf32>
    %61 = arith.negf %60 : vector<8x128xf32>
    %62 = math.exp %61 : vector<8x128xf32>
    %cst_36 = arith.constant 1.000000e+00 : f32
    %63 = vector.broadcast %cst_36 : f32 to vector<8x128xf32>
    %64 = arith.addf %63, %62 : vector<8x128xf32>
    %65 = arith.divf %63, %64 : vector<8x128xf32>
    %66 = arith.index_cast %c3_i32 : i32 to index
    %c0_37 = arith.constant 0 : index
    %c0_38 = arith.constant 0 : index
    %67 = vector.load %arg10[%66, %c0_37, %c0_38] : memref<8x8x128xf32, #tpu.memory_space<vmem>>, vector<1x8x128xf32>
    %68 = vector.shape_cast %67 : vector<1x8x128xf32> to vector<8x128xf32>
    %69 = vector.shape_cast %65 : vector<8x128xf32> to vector<1x8x128xf32>
    tpu.vector_store %arg10[%66, %c0_37, %c0_38], %69 {strides = array<i32>} : memref<8x8x128xf32, #tpu.memory_space<vmem>>, vector<1x8x128xf32>,
    %c4_i32 = arith.constant 4 : i32
    %70 = arith.index_cast %c4_i32 : i32 to index
    %c0_39 = arith.constant 0 : index
    %c0_40 = arith.constant 0 : index
    %71 = vector.load %arg10[%70, %c0_39, %c0_40] : memref<8x8x128xf32, #tpu.memory_space<vmem>>, vector<1x8x128xf32>
    %72 = vector.shape_cast %71 : vector<1x8x128xf32> to vector<8x128xf32>
    %cst_41 = arith.constant dense<0.000000e+00> : vector<8x128xf32>
    %73 = tpu.matmul %65, %12, %cst_41 {dimension_numbers = #tpu.dot_dimension_numbers<[1], [0], [0], [1], [0, 0, 1, 1], [], []>} : vector<8x128xf32>, vector<128x128xf32>, vector<8x128xf32> -> vector<8x128xf32>
    %74 = arith.addf %72, %73 : vector<8x128xf32>
    %75 = arith.negf %74 : vector<8x128xf32>
    %76 = math.exp %75 : vector<8x128xf32>
    %cst_42 = arith.constant 1.000000e+00 : f32
    %77 = vector.broadcast %cst_42 : f32 to vector<8x128xf32>
    %78 = arith.addf %77, %76 : vector<8x128xf32>
    %79 = arith.divf %77, %78 : vector<8x128xf32>
    %80 = arith.index_cast %c4_i32 : i32 to index
    %c0_43 = arith.constant 0 : index
    %c0_44 = arith.constant 0 : index
    %81 = vector.load %arg10[%80, %c0_43, %c0_44] : memref<8x8x128xf32, #tpu.memory_space<vmem>>, vector<1x8x128xf32>
    %82 = vector.shape_cast %81 : vector<1x8x128xf32> to vector<8x128xf32>
    %83 = vector.shape_cast %79 : vector<8x128xf32> to vector<1x8x128xf32>
    tpu.vector_store %arg10[%80, %c0_43, %c0_44], %83 {strides = array<i32>} : memref<8x8x128xf32, #tpu.memory_space<vmem>>, vector<1x8x128xf32>,
    %c5_i32 = arith.constant 5 : i32
    %84 = arith.index_cast %c5_i32 : i32 to index
    %c0_45 = arith.constant 0 : index
    %c0_46 = arith.constant 0 : index
    %85 = vector.load %arg10[%84, %c0_45, %c0_46] : memref<8x8x128xf32, #tpu.memory_space<vmem>>, vector<1x8x128xf32>
    %86 = vector.shape_cast %85 : vector<1x8x128xf32> to vector<8x128xf32>
    %cst_47 = arith.constant dense<0.000000e+00> : vector<8x128xf32>
    %87 = tpu.matmul %79, %12, %cst_47 {dimension_numbers = #tpu.dot_dimension_numbers<[1], [0], [0], [1], [0, 0, 1, 1], [], []>} : vector<8x128xf32>, vector<128x128xf32>, vector<8x128xf32> -> vector<8x128xf32>
    %88 = arith.addf %86, %87 : vector<8x128xf32>
    %89 = arith.negf %88 : vector<8x128xf32>
    %90 = math.exp %89 : vector<8x128xf32>
    %cst_48 = arith.constant 1.000000e+00 : f32
    %91 = vector.broadcast %cst_48 : f32 to vector<8x128xf32>
    %92 = arith.addf %91, %90 : vector<8x128xf32>
    %93 = arith.divf %91, %92 : vector<8x128xf32>
    %94 = arith.index_cast %c5_i32 : i32 to index
    %c0_49 = arith.constant 0 : index
    %c0_50 = arith.constant 0 : index
    %95 = vector.load %arg10[%94, %c0_49, %c0_50] : memref<8x8x128xf32, #tpu.memory_space<vmem>>, vector<1x8x128xf32>
    %96 = vector.shape_cast %95 : vector<1x8x128xf32> to vector<8x128xf32>
    %97 = vector.shape_cast %93 : vector<8x128xf32> to vector<1x8x128xf32>
    tpu.vector_store %arg10[%94, %c0_49, %c0_50], %97 {strides = array<i32>} : memref<8x8x128xf32, #tpu.memory_space<vmem>>, vector<1x8x128xf32>,
    %c6_i32 = arith.constant 6 : i32
    %98 = arith.index_cast %c6_i32 : i32 to index
    %c0_51 = arith.constant 0 : index
    %c0_52 = arith.constant 0 : index
    %99 = vector.load %arg10[%98, %c0_51, %c0_52] : memref<8x8x128xf32, #tpu.memory_space<vmem>>, vector<1x8x128xf32>
    %100 = vector.shape_cast %99 : vector<1x8x128xf32> to vector<8x128xf32>
    %cst_53 = arith.constant dense<0.000000e+00> : vector<8x128xf32>
    %101 = tpu.matmul %93, %12, %cst_53 {dimension_numbers = #tpu.dot_dimension_numbers<[1], [0], [0], [1], [0, 0, 1, 1], [], []>} : vector<8x128xf32>, vector<128x128xf32>, vector<8x128xf32> -> vector<8x128xf32>
    %102 = arith.addf %100, %101 : vector<8x128xf32>
    %103 = arith.negf %102 : vector<8x128xf32>
    %104 = math.exp %103 : vector<8x128xf32>
    %cst_54 = arith.constant 1.000000e+00 : f32
    %105 = vector.broadcast %cst_54 : f32 to vector<8x128xf32>
    %106 = arith.addf %105, %104 : vector<8x128xf32>
    %107 = arith.divf %105, %106 : vector<8x128xf32>
    %108 = arith.index_cast %c6_i32 : i32 to index
    %c0_55 = arith.constant 0 : index
    %c0_56 = arith.constant 0 : index
    %109 = vector.load %arg10[%108, %c0_55, %c0_56] : memref<8x8x128xf32, #tpu.memory_space<vmem>>, vector<1x8x128xf32>
    %110 = vector.shape_cast %109 : vector<1x8x128xf32> to vector<8x128xf32>
    %111 = vector.shape_cast %107 : vector<8x128xf32> to vector<1x8x128xf32>
    tpu.vector_store %arg10[%108, %c0_55, %c0_56], %111 {strides = array<i32>} : memref<8x8x128xf32, #tpu.memory_space<vmem>>, vector<1x8x128xf32>,
    %c7_i32 = arith.constant 7 : i32
    %112 = arith.index_cast %c7_i32 : i32 to index
    %c0_57 = arith.constant 0 : index
    %c0_58 = arith.constant 0 : index
    %113 = vector.load %arg10[%112, %c0_57, %c0_58] : memref<8x8x128xf32, #tpu.memory_space<vmem>>, vector<1x8x128xf32>
    %114 = vector.shape_cast %113 : vector<1x8x128xf32> to vector<8x128xf32>
    %cst_59 = arith.constant dense<0.000000e+00> : vector<8x128xf32>
    %115 = tpu.matmul %107, %12, %cst_59 {dimension_numbers = #tpu.dot_dimension_numbers<[1], [0], [0], [1], [0, 0, 1, 1], [], []>} : vector<8x128xf32>, vector<128x128xf32>, vector<8x128xf32> -> vector<8x128xf32>
    %116 = arith.addf %114, %115 : vector<8x128xf32>
    %117 = arith.negf %116 : vector<8x128xf32>
    %118 = math.exp %117 : vector<8x128xf32>
    %cst_60 = arith.constant 1.000000e+00 : f32
    %119 = vector.broadcast %cst_60 : f32 to vector<8x128xf32>
    %120 = arith.addf %119, %118 : vector<8x128xf32>
    %121 = arith.divf %119, %120 : vector<8x128xf32>
    %122 = arith.index_cast %c7_i32 : i32 to index
    %c0_61 = arith.constant 0 : index
    %c0_62 = arith.constant 0 : index
    %123 = vector.load %arg10[%122, %c0_61, %c0_62] : memref<8x8x128xf32, #tpu.memory_space<vmem>>, vector<1x8x128xf32>
    %124 = vector.shape_cast %123 : vector<1x8x128xf32> to vector<8x128xf32>
    %125 = vector.shape_cast %121 : vector<8x128xf32> to vector<1x8x128xf32>
    tpu.vector_store %arg10[%122, %c0_61, %c0_62], %125 {strides = array<i32>} : memref<8x8x128xf32, #tpu.memory_space<vmem>>, vector<1x8x128xf32>,
    %c8_i32 = arith.constant 8 : i32
    %c0_63 = arith.constant 0 : index
    %c0_64 = arith.constant 0 : index
    %126 = vector.load %arg9[%c0_63, %c0_64] : memref<8x128xf32, #tpu.memory_space<vmem>>, vector<8x128xf32>
    tpu.vector_store %arg9[%c0_63, %c0_64], %121 {strides = array<i32>} : memref<8x128xf32, #tpu.memory_space<vmem>>, vector<8x128xf32>,
    %c0_65 = arith.constant 0 : index
    %c0_66 = arith.constant 0 : index
    %c0_67 = arith.constant 0 : index
    %127 = vector.load %arg10[%c0_65, %c0_66, %c0_67] : memref<8x8x128xf32, #tpu.memory_space<vmem>>, vector<8x8x128xf32>
    %128 = vector.shape_cast %127 : vector<8x8x128xf32> to vector<64x128xf32>
    %c0_68 = arith.constant 0 : index
    %c0_69 = arith.constant 0 : index
    %129 = vector.load %arg6[%c0_68, %c0_69] : memref<128x128xf32, #tpu.memory_space<vmem>>, vector<128x128xf32>
    %cst_70 = arith.constant dense<0.000000e+00> : vector<64x128xf32>
    %130 = tpu.matmul %128, %129, %cst_70 {dimension_numbers = #tpu.dot_dimension_numbers<[1], [0], [0], [1], [0, 0, 1, 1], [], []>} : vector<64x128xf32>, vector<128x128xf32>, vector<64x128xf32> -> vector<64x128xf32>
    %c0_71 = arith.constant 0 : index
    %c0_72 = arith.constant 0 : index
    %131 = vector.load %arg7[%c0_71, %c0_72] : memref<1x128xf32, #tpu.memory_space<vmem>>, vector<1x128xf32>
    %132 = vector.broadcast %131 : vector<1x128xf32> to vector<64x128xf32>
    %133 = arith.addf %130, %132 : vector<64x128xf32>
    %134 = vector.shape_cast %133 : vector<64x128xf32> to vector<8x8x128xf32>
    %c0_73 = arith.constant 0 : index
    %c0_74 = arith.constant 0 : index
    %c0_75 = arith.constant 0 : index
    %135 = vector.load %arg8[%c0_73, %c0_74, %c0_75] : memref<8x8x128xf32, #tpu.memory_space<vmem>>, vector<8x8x128xf32>
    tpu.vector_store %arg8[%c0_73, %c0_74, %c0_75], %134 {strides = array<i32>} : memref<8x8x128xf32, #tpu.memory_space<vmem>>, vector<8x8x128xf32>,
    return
  }
  func.func @transform_0(%arg0: i32, %arg1: i32) -> (i32, i32, i32) {
    %c0_i32 = arith.constant 0 : i32
    %c0_i32_0 = arith.constant 0 : i32
    return %arg1, %arg0, %c0_i32 : i32, i32, i32
  }
  func.func @transform_1(%arg0: i32, %arg1: i32) -> (i32, i32) {
    %c0_i32 = arith.constant 0 : i32
    %c0_i32_0 = arith.constant 0 : i32
    %c0_i32_1 = arith.constant 0 : i32
    return %c0_i32, %c0_i32_0 : i32, i32
  }
  func.func @transform_2(%arg0: i32, %arg1: i32) -> (i32, i32) {
    %c0_i32 = arith.constant 0 : i32
    %c0_i32_0 = arith.constant 0 : i32
    %c0_i32_1 = arith.constant 0 : i32
    return %c0_i32, %c0_i32_0 : i32, i32
  }
  func.func @transform_3(%arg0: i32, %arg1: i32) -> (i32, i32) {
    %c0_i32 = arith.constant 0 : i32
    %c0_i32_0 = arith.constant 0 : i32
    %c0_i32_1 = arith.constant 0 : i32
    return %c0_i32, %c0_i32_0 : i32, i32
  }
  func.func @transform_4(%arg0: i32, %arg1: i32) -> (i32, i32) {
    %c0_i32 = arith.constant 0 : i32
    %c0_i32_0 = arith.constant 0 : i32
    %c0_i32_1 = arith.constant 0 : i32
    return %c0_i32, %c0_i32_0 : i32, i32
  }
  func.func @transform_5(%arg0: i32, %arg1: i32) -> (i32, i32) {
    %c0_i32 = arith.constant 0 : i32
    %c0_i32_0 = arith.constant 0 : i32
    %c0_i32_1 = arith.constant 0 : i32
    return %c0_i32, %c0_i32_0 : i32, i32
  }
  func.func @transform_6(%arg0: i32, %arg1: i32) -> (i32, i32, i32) {
    %c0_i32 = arith.constant 0 : i32
    %c0_i32_0 = arith.constant 0 : i32
    return %arg1, %arg0, %c0_i32 : i32, i32, i32
  }
}

</mosaic_0001>

<bundles_post_ra>
// kernel: tpu_custom_call.1
= control target key start
LH: loop header
LB: loop body
LE: loop exit
PB: predicated region body
PF: predicated region fallthrough
CT: control target
= control target key end

     0   :  { %11 = vsyncpa [#allocation5], 0  ;;  %s1073_s0 = inlined_call_operand.hbm [shape: f32[8,8,128], index: 0, kind: input, shape index: {}]   ;;  %s1074_s1 = inlined_call_operand.hbm [shape: f32[128,128], index: 1, kind: input, shape index: {}]   ;;  %s1075_s2 = inlined_call_operand.hbm [shape: f32[128,128], index: 2, kind: input, shape index: {}]   ;;  %s1076_s3 = inlined_call_operand.vmem [shape: f32[1,128], index: 3, kind: input, shape index: {}]   ;;  %s1077_s4 = inlined_call_operand.hbm [shape: f32[128,128], index: 4, kind: input, shape index: {}]   ;;  %s1078_s5 = inlined_call_operand.vmem [shape: f32[1,128], index: 5, kind: input, shape index: {}]   ;;  %s1079_s6 = inlined_call_operand.hbm [shape: f32[8,8,128], index: 6, kind: output, shape index: {}]  }
   0x1   :  { %12 = vsyncpa [#allocation8], 0 }
   0x2   :  { %13 = vsyncpa [#allocation11], 0 }
   0x3   :  { %14 = vsyncpa [#allocation6], 0  ;;  %s32_s23 = sshll.u32 %s1074_s1, 4  ;;  %s806_s24 = smov [#allocation7]   ;;  %s33_s23 = int_to_ptr.hbm [resolvable:$true] %s32_s23 }
   0x4   :  { %s34_s25 = sshll.u32 %s806_s24, 4  ;;  %s19_s28 = sshll.u32 %s1073_s0, 4  ;;  %s35_s25 = int_to_ptr.vmem [resolvable:$true] %s34_s25  ;;  %s20_s28 = int_to_ptr.hbm [resolvable:$true] %s19_s28 }
   0x5   :  { %s807_s29 = smov 128   ;;  %s808_s30 = smov 8  }
   0x6   :  { %40 = dma.hbm_to_vmem [thread:$0]  %s33_s23, 2048, %s35_s25, [#allocation8], %s807_s29, %s807_s29, %s808_s30  }
   0x7   :  { %s809_s7 = smov [#allocation4]   ;;  %s45_s1 = sshll.u32 %s1075_s2, 4  ;;  %s46_s1 = int_to_ptr.hbm [resolvable:$true] %s45_s1 }
   0x8   :  { %s21_s8 = sshll.u32 %s809_s7, 4  ;;  %s60_s12 = sshll.u32 %s1077_s4, 4  ;;  %s22_s8 = int_to_ptr.vmem [resolvable:$true] %s21_s8  ;;  %s61_s12 = int_to_ptr.hbm [resolvable:$true] %s60_s12 }
   0x9   :  { %27 = dma.hbm_to_vmem [thread:$0]  %s20_s28, 1024, %s22_s8, [#allocation5], %s807_s29, %s807_s29, %s808_s30  }
   0xa   :  { %s810_s13 = smov [#allocation9]   ;;  %s811_s15 = smov [#allocation10]  }
   0xb   :  { %s47_s14 = sshll.u32 %s810_s13, 4  ;;  %s62_s2 = sshll.u32 %s811_s15, 4  ;;  %s48_s14 = int_to_ptr.vmem [resolvable:$true] %s47_s14  ;;  %s63_s2 = int_to_ptr.vmem [resolvable:$true] %s62_s2 }
   0xc   :  { %53 = dma.hbm_to_vmem [thread:$0]  %s46_s1, 2048, %s48_s14, [#allocation8], %s807_s29, %s807_s29, %s808_s30  }
   0xd   :  { %68 = dma.hbm_to_vmem [thread:$0]  %s61_s12, 2048, %s63_s2, [#allocation11], %s807_s29, %s807_s29, %s808_s30  }
   0xe   :  { %798 = dma.done.wait [#allocation5], 1024  }
   0xf   :  { %799 = vsyncadd [#allocation5], 4294966272 }
  0x10   :  { %800 = dma.done.wait [#allocation8], 4096  }
  0x11   :  { %801 = vsyncadd [#allocation8], 4294963200 }
  0x12   :  { %802 = dma.done.wait [#allocation11], 2048  }
  0x13   :  { %803 = vsyncadd [#allocation11], 4294965248  ;;  %v115_v0 = vld [vmem:[#allocation7 + $0x78] sm:$0xff]  ;;  %v114_v1 = vld [vmem:[#allocation7 + $0x70] sm:$0xff]  ;;  %v812_v33 = vmov 0.0   ;;  %s613_s21 = sshll.u32 %s1079_s6, 4  ;;  %s614_s21 = int_to_ptr.hbm [resolvable:$true] %s613_s21 }
  0x14   :  { %v873_v2 = vld [vmem:[#allocation9 + $0x78] sm:$0xff]  ;;  %120 = vmatpush.msra.mxu0 %v115_v0  ;;  %v876_v3 = vld [vmem:[#allocation9 + $0x70] sm:$0xff]  ;;  %v113_v4 = vld [vmem:[#allocation7 + $0x68] sm:$0xff] }
  0x15   :  { %187 = vmatpush.msra.mxu1 %v873_v2  ;;  %v878_v5 = vld [vmem:[#allocation9 + $0x68] sm:$0xff]  ;;  %230 = vmatpush.msra.mxu3 %v873_v2  ;;  %v112_v6 = vld [vmem:[#allocation7 + $0x60] sm:$0xff]  ;;  %v111_v8 = vld [vmem:[#allocation7 + $0x58] sm:$0xff] }
  0x16   :  { %359 = vmatpush.msra.mxu2 %v873_v2  ;;  %121 = vmatpush.msra.mxu0 %v114_v1  ;;  %v883_v7 = vld [vmem:[#allocation9 + $0x60] sm:$0xff]  ;;  %v888_v9 = vld [vmem:[#allocation9 + $0x58] sm:$0xff]  ;;  %v110_v10 = vld [vmem:[#allocation7 + $0x50] sm:$0xff] }
  0x17   :  { %188 = vmatpush.msra.mxu1 %v876_v3  ;;  %231 = vmatpush.msra.mxu3 %v876_v3  ;;  %v893_v11 = vld [vmem:[#allocation9 + $0x50] sm:$0xff]  ;;  %v109_v12 = vld [vmem:[#allocation7 + $0x48] sm:$0xff]  ;;  %v108_v14 = vld [vmem:[#allocation7 + $0x40] sm:$0xff] }
  0x18   :  { %360 = vmatpush.msra.mxu2 %v876_v3  ;;  %122 = vmatpush.msra.mxu0 %v113_v4  ;;  %v898_v13 = vld [vmem:[#allocation9 + $0x48] sm:$0xff]  ;;  %v903_v15 = vld [vmem:[#allocation9 + $0x40] sm:$0xff]  ;;  %v107_v16 = vld [vmem:[#allocation7 + $0x38] sm:$0xff] }
  0x19   :  { %189 = vmatpush.msra.mxu1 %v878_v5  ;;  %232 = vmatpush.msra.mxu3 %v878_v5  ;;  %v908_v17 = vld [vmem:[#allocation9 + $0x38] sm:$0xff]  ;;  %v106_v18 = vld [vmem:[#allocation7 + $0x30] sm:$0xff]  ;;  %v105_v20 = vld [vmem:[#allocation7 + $0x28] sm:$0xff] }
  0x1a   :  { %361 = vmatpush.msra.mxu2 %v878_v5  ;;  %123 = vmatpush.msra.mxu0 %v112_v6  ;;  %v913_v19 = vld [vmem:[#allocation9 + $0x30] sm:$0xff]  ;;  %v918_v21 = vld [vmem:[#allocation9 + $0x28] sm:$0xff]  ;;  %v104_v22 = vld [vmem:[#allocation7 + $0x20] sm:$0xff] }
  0x1b   :  { %190 = vmatpush.msra.mxu1 %v883_v7  ;;  %233 = vmatpush.msra.mxu3 %v883_v7  ;;  %v923_v23 = vld [vmem:[#allocation9 + $0x20] sm:$0xff]  ;;  %v103_v24 = vld [vmem:[#allocation7 + $0x18] sm:$0xff]  ;;  %v102_v26 = vld [vmem:[#allocation7 + $0x10] sm:$0xff] }
  0x1c   :  { %362 = vmatpush.msra.mxu2 %v883_v7  ;;  %124 = vmatpush.msra.mxu0 %v111_v8  ;;  %v928_v25 = vld [vmem:[#allocation9 + $0x18] sm:$0xff]  ;;  %v933_v27 = vld [vmem:[#allocation9 + $0x10] sm:$0xff]  ;;  %v101_v28 = vld [vmem:[#allocation7 + $0x8] sm:$0xff] }
  0x1d   :  { %191 = vmatpush.msra.mxu1 %v888_v9  ;;  %234 = vmatpush.msra.mxu3 %v888_v9  ;;  %v938_v29 = vld [vmem:[#allocation9 + $0x8] sm:$0xff]  ;;  %v100_v30 = vld [vmem:[#allocation7] sm:$0xff]  ;;  %v94_v55 = vld [vmem:[#allocation4 + $0x10] sm:$0xff] }
  0x1e   :  { %363 = vmatpush.msra.mxu2 %v888_v9  ;;  %125 = vmatpush.msra.mxu0 %v110_v10  ;;  %v943_v31 = vld [vmem:[#allocation9] sm:$0xff]  ;;  %v93_v38 = vld [vmem:[#allocation4 + $0x8] sm:$0xff] }
  0x1f   :  { %192 = vmatpush.msra.mxu1 %v893_v11  ;;  %235 = vmatpush.msra.mxu3 %v893_v11  ;;  %v92_v32 = vld [vmem:[#allocation4] sm:$0xff] }
  0x20   :  { %364 = vmatpush.msra.mxu2 %v893_v11  ;;  %126 = vmatpush.msra.mxu0 %v109_v12  ;;  %v1020_v34 = vld [vmem:[%s1076_s3] ss:$0 sm:$0xff] }
  0x21   :  { %193 = vmatpush.msra.mxu1 %v898_v13  ;;  %236 = vmatpush.msra.mxu3 %v898_v13 }
  0x22   :  { %365 = vmatpush.msra.mxu2 %v898_v13  ;;  %127 = vmatpush.msra.mxu0 %v108_v14 }
  0x23   :  { %194 = vmatpush.msra.mxu1 %v903_v15  ;;  %237 = vmatpush.msra.mxu3 %v903_v15 }
  0x24   :  { %366 = vmatpush.msra.mxu2 %v903_v15  ;;  %128 = vmatpush.msra.mxu0 %v107_v16 }
  0x25   :  { %195 = vmatpush.msra.mxu1 %v908_v17  ;;  %238 = vmatpush.msra.mxu3 %v908_v17 }
  0x26   :  { %367 = vmatpush.msra.mxu2 %v908_v17  ;;  %129 = vmatpush.msra.mxu0 %v106_v18 }
  0x27   :  { %196 = vmatpush.msra.mxu1 %v913_v19  ;;  %239 = vmatpush.msra.mxu3 %v913_v19 }
  0x28   :  { %368 = vmatpush.msra.mxu2 %v913_v19  ;;  %130 = vmatpush.msra.mxu0 %v105_v20 }
  0x29   :  { %197 = vmatpush.msra.mxu1 %v918_v21  ;;  %240 = vmatpush.msra.mxu3 %v918_v21 }
  0x2a   :  { %369 = vmatpush.msra.mxu2 %v918_v21  ;;  %131 = vmatpush.msra.mxu0 %v104_v22 }
  0x2b   :  { %198 = vmatpush.msra.mxu1 %v923_v23  ;;  %241 = vmatpush.msra.mxu3 %v923_v23 }
  0x2c   :  { %370 = vmatpush.msra.mxu2 %v923_v23  ;;  %132 = vmatpush.msra.mxu0 %v103_v24 }
  0x2d   :  { %199 = vmatpush.msra.mxu1 %v928_v25  ;;  %242 = vmatpush.msra.mxu3 %v928_v25 }
  0x2e   :  { %371 = vmatpush.msra.mxu2 %v928_v25  ;;  %133 = vmatpush.msra.mxu0 %v102_v26  ;;  %v552_v26 = vld [vmem:[#allocation10 + $0x70] sm:$0xff] }
  0x2f   :  { %200 = vmatpush.msra.mxu1 %v933_v27  ;;  %243 = vmatpush.msra.mxu3 %v933_v27 }
  0x30   :  { %372 = vmatpush.msra.mxu2 %v933_v27  ;;  %134 = vmatpush.msra.mxu0 %v101_v28  ;;  %v550_v28 = vld [vmem:[#allocation10 + $0x60] sm:$0xff] }
  0x31   :  { %201 = vmatpush.msra.mxu1 %v938_v29  ;;  %244 = vmatpush.msra.mxu3 %v938_v29 }
  0x32   :  { %373 = vmatpush.msra.mxu2 %v938_v29  ;;  %135 = vmatpush.msra.mxu0 %v100_v30  ;;  %v548_v30 = vld [vmem:[#allocation10 + $0x50] sm:$0xff] }
  0x33   :  { %202 = vmatpush.msra.mxu1 %v943_v31  ;;  %136 = vmatmul.f32.vlgmr.msra.gmra.mxu0 %v92_v32  ;;  %v546_v32 = vld [vmem:[#allocation10 + $0x40] sm:$0xff] }
  0x34   :  { %203 = vmatmul.f32.vlgmr.msra.gmra.mxu1 %v812_v33  ;;  %245 = vmatpush.msra.mxu3 %v943_v31  ;;  %v545_v33 = vld [vmem:[#allocation10 + $0x38] sm:$0xff] }
  0x35   :  { %316 = vmatpush.msrb.mxu1 %v873_v2  ;;  %374 = vmatpush.msra.mxu2 %v943_v31 }
  0x36   :  { %273 = vmatpush.msrb.mxu3 %v873_v2  ;;  %445 = vmatpush.msrb.mxu0 %v873_v2 }
  0x37   :  { %317 = vmatpush.msrb.mxu1 %v876_v3 }
  0x38   :  { %274 = vmatpush.msrb.mxu3 %v876_v3  ;;  %446 = vmatpush.msrb.mxu0 %v876_v3 }
  0x39   :  { %318 = vmatpush.msrb.mxu1 %v878_v5 }
  0x3a   :  { %275 = vmatpush.msrb.mxu3 %v878_v5  ;;  %447 = vmatpush.msrb.mxu0 %v878_v5 }
  0x3b   :  { %319 = vmatpush.msrb.mxu1 %v883_v7  ;;  %139 = vmatmul.f32.gmra.mxu0 %v93_v38  ;;  %v542_v38 = vld [vmem:[#allocation10 + $0x20] sm:$0xff] }
  0x3c   :  { %276 = vmatpush.msrb.mxu3 %v883_v7  ;;  %448 = vmatpush.msrb.mxu0 %v883_v7 }
  0x3d   :  { %320 = vmatpush.msrb.mxu1 %v888_v9 }
  0x3e   :  { %277 = vmatpush.msrb.mxu3 %v888_v9  ;;  %449 = vmatpush.msrb.mxu0 %v888_v9 }
  0x3f   :  { %321 = vmatpush.msrb.mxu1 %v893_v11 }
  0x40   :  { %278 = vmatpush.msrb.mxu3 %v893_v11  ;;  %450 = vmatpush.msrb.mxu0 %v893_v11 }
  0x41   :  { %322 = vmatpush.msrb.mxu1 %v898_v13 }
  0x42   :  { %279 = vmatpush.msrb.mxu3 %v898_v13  ;;  %451 = vmatpush.msrb.mxu0 %v898_v13 }
  0x43   :  { %323 = vmatpush.msrb.mxu1 %v903_v15  ;;  %142 = vmatmul.f32.gmra.mxu0 %v94_v55 }
  0x44   :  { %280 = vmatpush.msrb.mxu3 %v903_v15  ;;  %452 = vmatpush.msrb.mxu0 %v903_v15 }
  0x45   :  { %324 = vmatpush.msrb.mxu1 %v908_v17 }
  0x46   :  { %281 = vmatpush.msrb.mxu3 %v908_v17  ;;  %453 = vmatpush.msrb.mxu0 %v908_v17 }
  0x47   :  { %325 = vmatpush.msrb.mxu1 %v913_v19 }
  0x48   :  { %282 = vmatpush.msrb.mxu3 %v913_v19  ;;  %454 = vmatpush.msrb.mxu0 %v913_v19 }
  0x49   :  { %326 = vmatpush.msrb.mxu1 %v918_v21 }
  0x4a   :  { %283 = vmatpush.msrb.mxu3 %v918_v21  ;;  %455 = vmatpush.msrb.mxu0 %v918_v21 }
  0x4b   :  { %327 = vmatpush.msrb.mxu1 %v923_v23 }
  0x4c   :  { %284 = vmatpush.msrb.mxu3 %v923_v23  ;;  %456 = vmatpush.msrb.mxu0 %v923_v23 }
  0x4d   :  { %328 = vmatpush.msrb.mxu1 %v928_v25 }
  0x4e   :  { %285 = vmatpush.msrb.mxu3 %v928_v25  ;;  %457 = vmatpush.msrb.mxu0 %v928_v25 }
  0x4f   :  { %329 = vmatpush.msrb.mxu1 %v933_v27 }
  0x50   :  { %286 = vmatpush.msrb.mxu3 %v933_v27  ;;  %458 = vmatpush.msrb.mxu0 %v933_v27 }
  0x51   :  { %330 = vmatpush.msrb.mxu1 %v938_v29 }
  0x52   :  { %287 = vmatpush.msrb.mxu3 %v938_v29  ;;  %459 = vmatpush.msrb.mxu0 %v938_v29 }
  0x53   :  { %331 = vmatpush.msrb.mxu1 %v943_v31 }
  0x54   :  { %288 = vmatpush.msrb.mxu3 %v943_v31  ;;  %460 = vmatpush.msrb.mxu0 %v943_v31 }
  0x55   :  { %488 = vmatpush.msra.mxu1 %v873_v2 }
  0x57   :  { %489 = vmatpush.msra.mxu1 %v876_v3 }
  0x59   :  { %490 = vmatpush.msra.mxu1 %v878_v5 }
  0x5b   :  { %491 = vmatpush.msra.mxu1 %v883_v7 }
  0x5d   :  { %492 = vmatpush.msra.mxu1 %v888_v9 }
  0x5f   :  { %493 = vmatpush.msra.mxu1 %v893_v11 }
  0x61   :  { %494 = vmatpush.msra.mxu1 %v898_v13 }
  0x63   :  { %495 = vmatpush.msra.mxu1 %v903_v15 }
  0x65   :  { %496 = vmatpush.msra.mxu1 %v908_v17 }
  0x67   :  { %497 = vmatpush.msra.mxu1 %v913_v19 }
  0x69   :  { %498 = vmatpush.msra.mxu1 %v918_v21 }
  0x6b   :  { %499 = vmatpush.msra.mxu1 %v923_v23 }
  0x6d   :  { %500 = vmatpush.msra.mxu1 %v928_v25 }
  0x6f   :  { %501 = vmatpush.msra.mxu1 %v933_v27 }
  0x71   :  { %502 = vmatpush.msra.mxu1 %v938_v29 }
  0x73   :  { %503 = vmatpush.msra.mxu1 %v943_v31 }
  0xb0   :  { %v137_v35 = vpop.f32.mrf.mxu0 }
  0xb1   :  { %v204_v36 = vpop.f32.mrf.mxu1  ;;  %v138_v37 = vadd.f32 %v1020_v34, %v137_v35  ;;  %v544_v35 = vld [vmem:[#allocation10 + $0x30] sm:$0xff] }
  0xb3   :  { %v207_v39 = vadd.f32 %v204_v36, %v138_v37  ;;  %v543_v36 = vld [vmem:[#allocation10 + $0x28] sm:$0xff] }
  0xb5   :  { %v628_v40 = vmul.f32 -1.442695, %v207_v39 }
  0xb7   :  { %646 = vpow2.f32 %v628_v40  ;;  %v541_v40 = vld [vmem:[#allocation10 + $0x18] sm:$0xff] }
  0xb8   :  { %v140_v53 = vpop.f32.mrf.mxu0 }
  0xb9   :  { %v141_v54 = vadd.f32 %v1020_v34, %v140_v53 }
  0xbd   :  { %v647_v41 = vpop.eup %646 }
  0xbe   :  { %v211_v42 = vadd.f32 1.0, %v647_v41  ;;  %v540_v41 = vld [vmem:[#allocation10 + $0x10] sm:$0xff] }
  0xc0   :  { %648 = vrcp.f32 %v211_v42  ;;  %v223_v46 = vand.u32 2147483648, %v211_v42  ;;  %v221_v48 = vand.u32 2147483647, %v211_v42  ;;  %vm217_vm1 = vweird.f32 %v211_v42  ;;  %v143_v8 = vpop.f32.mrf.mxu0 }
  0xc2   :  { %v224_v50 = vor.u32 1.1754944e-38, %v223_v46  ;;  %vm222_vm3 = vcmp.eq.f32.partialorder %v221_v48, 8.507059e+37 }
  0xc6   :  { %v649_v43 = vpop.eup %648 }
  0xc7   :  { %v213_v44 = vmul.f32 %v649_v43, %v211_v42  ;;  %vm218_vm0 = vweird.f32 %v649_v43  ;;  %v96_v42 = vld [vmem:[#allocation4 + $0x20] sm:$0xff] }
  0xc8   :  { %vm219_vm2 = vmor %vm217_vm1, %vm218_vm0 }
  0xc9   :  { %v214_v45 = vsub.f32 1.0, %v213_v44 }
  0xcb   :  { %v215_v47 = vmul.f32 %v649_v43, %v214_v45  ;;  %v539_v45 = vld [vmem:[#allocation10 + $0x8] sm:$0xff] }
  0xcd   :  { %v216_v49 = vadd.f32 %v649_v43, %v215_v47  ;;  %v538_v47 = vld [vmem:[#allocation10] sm:$0xff] }
  0xcf   :  { %v220_v51 = vsel %vm219_vm2, %v649_v43, %v216_v49 }
  0xd0   :  { %v1023_v52 = vsel %vm222_vm3, %v224_v50, %v220_v51 }
  0xd1   :  { %246 = vmatmul.f32.vlgmr.msra.gmra.mxu3 %v1023_v52 }
  0xd2   :  { %402 = vmatpush.msra.mxu3 %v873_v2 }
  0xd4   :  { %403 = vmatpush.msra.mxu3 %v876_v3 }
  0xd6   :  { %404 = vmatpush.msra.mxu3 %v878_v5 }
  0xd8   :  { %405 = vmatpush.msra.mxu3 %v883_v7  ;;  %v95_v7 = vld [vmem:[#allocation4 + $0x18] sm:$0xff] }
  0xd9   :  { %145 = vmatmul.f32.gmra.mxu0 %v95_v7 }
  0xda   :  { %406 = vmatpush.msra.mxu3 %v888_v9  ;;  %v144_v9 = vadd.f32 %v1020_v34, %v143_v8 }
  0xdc   :  { %407 = vmatpush.msra.mxu3 %v893_v11 }
  0xde   :  { %408 = vmatpush.msra.mxu3 %v898_v13 }
  0xe0   :  { %409 = vmatpush.msra.mxu3 %v903_v15 }
  0xe1   :  { %148 = vmatmul.f32.gmra.mxu0 %v96_v42 }
  0xe2   :  { %410 = vmatpush.msra.mxu3 %v908_v17 }
  0xe4   :  { %411 = vmatpush.msra.mxu3 %v913_v19 }
  0xe6   :  { %412 = vmatpush.msra.mxu3 %v918_v21 }
  0xe8   :  { %413 = vmatpush.msra.mxu3 %v923_v23 }
  0xea   :  { %414 = vmatpush.msra.mxu3 %v928_v25  ;;  %v553_v25 = vld [vmem:[#allocation10 + $0x78] sm:$0xff] }
  0xeb   :  { %558 = vmatpush.msrb.mxu2 %v553_v25 }
  0xec   :  { %415 = vmatpush.msra.mxu3 %v933_v27  ;;  %v551_v27 = vld [vmem:[#allocation10 + $0x68] sm:$0xff] }
  0xed   :  { %559 = vmatpush.msrb.mxu2 %v552_v26 }
  0xee   :  { %416 = vmatpush.msra.mxu3 %v938_v29  ;;  %v549_v29 = vld [vmem:[#allocation10 + $0x58] sm:$0xff] }
  0xef   :  { %560 = vmatpush.msrb.mxu2 %v551_v27 }
  0xf0   :  { %417 = vmatpush.msra.mxu3 %v943_v31  ;;  %v547_v31 = vld [vmem:[#allocation10 + $0x48] sm:$0xff] }
  0xf1   :  { %561 = vmatpush.msrb.mxu2 %v550_v28 }
  0xf3   :  { %562 = vmatpush.msrb.mxu2 %v549_v29 }
  0xf5   :  { %563 = vmatpush.msrb.mxu2 %v548_v30 }
  0xf7   :  { %564 = vmatpush.msrb.mxu2 %v547_v31 }
  0xf9   :  { %565 = vmatpush.msrb.mxu2 %v546_v32 }
  0xfb   :  { %566 = vmatpush.msrb.mxu2 %v545_v33 }
  0xfd   :  { %567 = vmatpush.msrb.mxu2 %v544_v35 }
  0xff   :  { %568 = vmatpush.msrb.mxu2 %v543_v36 }
 0x101   :  { %569 = vmatpush.msrb.mxu2 %v542_v38 }
 0x103   :  { %570 = vmatpush.msrb.mxu2 %v541_v40 }
 0x105   :  { %571 = vmatpush.msrb.mxu2 %v540_v41 }
 0x107   :  { %572 = vmatpush.msrb.mxu2 %v539_v45 }
 0x109   :  { %573 = vmatpush.msrb.mxu2 %v538_v47 }
 0x154   :  { %v247_v56 = vpop.f32.mrf.mxu3 }
 0x155   :  { %v250_v57 = vadd.f32 %v247_v56, %v141_v54 }
 0x156   :  { %v146_v37 = vpop.f32.mrf.mxu0 }
 0x157   :  { %v629_v58 = vmul.f32 -1.442695, %v250_v57  ;;  %v147_v39 = vadd.f32 %v1020_v34, %v146_v37 }
 0x159   :  { %650 = vpow2.f32 %v629_v58 }
 0x15f   :  { %v651_v59 = vpop.eup %650 }
 0x160   :  { %v254_v60 = vadd.f32 1.0, %v651_v59 }
 0x162   :  { %652 = vrcp.f32 %v254_v60  ;;  %v266_v0 = vand.u32 2147483648, %v254_v60  ;;  %v264_v2 = vand.u32 2147483647, %v254_v60  ;;  %vm260_vm5 = vweird.f32 %v254_v60 }
 0x164   :  { %v267_v4 = vor.u32 1.1754944e-38, %v266_v0  ;;  %vm265_vm7 = vcmp.eq.f32.partialorder %v264_v2, 8.507059e+37 }
 0x168   :  { %v653_v61 = vpop.eup %652 }
 0x169   :  { %v256_v62 = vmul.f32 %v653_v61, %v254_v60  ;;  %vm261_vm4 = vweird.f32 %v653_v61 }
 0x16a   :  { %vm262_vm6 = vmor %vm260_vm5, %vm261_vm4 }
 0x16b   :  { %v257_v63 = vsub.f32 1.0, %v256_v62 }
 0x16d   :  { %v258_v1 = vmul.f32 %v653_v61, %v257_v63 }
 0x16f   :  { %v259_v3 = vadd.f32 %v653_v61, %v258_v1  ;;  %v97_v1 = vld [vmem:[#allocation4 + $0x28] sm:$0xff] }
 0x170   :  { %151 = vmatmul.f32.gmra.mxu0 %v97_v1 }
 0x171   :  { %v263_v5 = vsel %vm262_vm6, %v653_v61, %v259_v3  ;;  %v149_v61 = vpop.f32.mrf.mxu0  ;;  %v1054_v3 = vld [vmem:[%s1078_s5] ss:$0 sm:$0xff]  ;;  %s813_s5 = smov [#allocation12]  }
 0x172   :  { %v1043_v6 = vsel %vm265_vm7, %v267_v4, %v263_v5  ;;  %v150_v62 = vadd.f32 %v1020_v34, %v149_v61  ;;  %s611_s18 = sshll.u32 %s813_s5, 4  ;;  %s612_s18 = int_to_ptr.vmem [resolvable:$true] %s611_s18 }
 0x173   :  { %289 = vmatmul.f32.vlgmr.msrb.gmra.mxu3 %v1043_v6 }
 0x1ed   :  { %v152_v25 = vpop.f32.mrf.mxu0 }
 0x1ee   :  { %v153_v26 = vadd.f32 %v1020_v34, %v152_v25 }
 0x1f6   :  { %v290_v10 = vpop.f32.mrf.mxu3 }
 0x1f7   :  { %v293_v11 = vadd.f32 %v290_v10, %v144_v9 }
 0x1f9   :  { %v630_v12 = vmul.f32 -1.442695, %v293_v11 }
 0x1fb   :  { %654 = vpow2.f32 %v630_v12 }
 0x201   :  { %v655_v13 = vpop.eup %654 }
 0x202   :  { %v297_v14 = vadd.f32 1.0, %v655_v13 }
 0x204   :  { %656 = vrcp.f32 %v297_v14  ;;  %v309_v18 = vand.u32 2147483648, %v297_v14  ;;  %v307_v20 = vand.u32 2147483647, %v297_v14  ;;  %vm303_vm9 = vweird.f32 %v297_v14 }
 0x206   :  { %v310_v22 = vor.u32 1.1754944e-38, %v309_v18  ;;  %vm308_vm11 = vcmp.eq.f32.partialorder %v307_v20, 8.507059e+37 }
 0x20a   :  { %v657_v15 = vpop.eup %656 }
 0x20b   :  { %v299_v16 = vmul.f32 %v657_v15, %v297_v14  ;;  %vm304_vm8 = vweird.f32 %v657_v15 }
 0x20c   :  { %vm305_vm10 = vmor %vm303_vm9, %vm304_vm8 }
 0x20d   :  { %v300_v17 = vsub.f32 1.0, %v299_v16 }
 0x20f   :  { %v301_v19 = vmul.f32 %v657_v15, %v300_v17 }
 0x211   :  { %v302_v21 = vadd.f32 %v657_v15, %v301_v19 }
 0x213   :  { %v306_v23 = vsel %vm305_vm10, %v657_v15, %v302_v21 }
 0x214   :  { %v311_v24 = vsel %vm308_vm11, %v310_v22, %v306_v23  ;;  %v98_v23 = vld [vmem:[#allocation4 + $0x30] sm:$0xff] }
 0x215   :  { %332 = vmatmul.f32.vlgmr.msrb.gmra.mxu1 %v311_v24  ;;  %154 = vmatmul.f32.gmra.mxu0 %v98_v23 }
 0x292   :  { %v333_v43 = vpop.f32.mrf.mxu1  ;;  %v155_v45 = vpop.f32.mrf.mxu0 }
 0x293   :  { %v336_v44 = vadd.f32 %v333_v43, %v147_v39  ;;  %v156_v47 = vadd.f32 %v1020_v34, %v155_v45 }
 0x295   :  { %v631_v46 = vmul.f32 -1.442695, %v336_v44 }
 0x297   :  { %658 = vpow2.f32 %v631_v46 }
 0x29d   :  { %v659_v48 = vpop.eup %658 }
 0x29e   :  { %v340_v49 = vadd.f32 1.0, %v659_v48 }
 0x2a0   :  { %660 = vrcp.f32 %v340_v49  ;;  %v352_v54 = vand.u32 2147483648, %v340_v49  ;;  %v350_v56 = vand.u32 2147483647, %v340_v49  ;;  %vm346_vm13 = vweird.f32 %v340_v49 }
 0x2a2   :  { %v353_v58 = vor.u32 1.1754944e-38, %v352_v54  ;;  %vm351_vm15 = vcmp.eq.f32.partialorder %v350_v56, 8.507059e+37 }
 0x2a6   :  { %v661_v50 = vpop.eup %660 }
 0x2a7   :  { %v342_v51 = vmul.f32 %v661_v50, %v340_v49  ;;  %vm347_vm12 = vweird.f32 %v661_v50 }
 0x2a8   :  { %vm348_vm14 = vmor %vm346_vm13, %vm347_vm12 }
 0x2a9   :  { %v343_v53 = vsub.f32 1.0, %v342_v51 }
 0x2ab   :  { %v344_v55 = vmul.f32 %v661_v50, %v343_v53 }
 0x2ad   :  { %v345_v57 = vadd.f32 %v661_v50, %v344_v55 }
 0x2af   :  { %v349_v59 = vsel %vm348_vm14, %v661_v50, %v345_v57 }
 0x2b0   :  { %v354_v60 = vsel %vm351_vm15, %v353_v58, %v349_v59 }
 0x2b1   :  { %375 = vmatmul.f32.vlgmr.msra.gmra.mxu2 %v354_v60 }
 0x2b9   :  { %574 = vmatmul.f32.vlgmr.msrb.gmra.mxu2 %v1023_v52 }
 0x2c1   :  { %577 = vmatmul.f32.gmra.mxu2 %v1043_v6 }
 0x2c9   :  { %580 = vmatmul.f32.gmra.mxu2 %v311_v24  ;;  %v99_v24 = vld [vmem:[#allocation4 + $0x38] sm:$0xff] }
 0x2ca   :  { %157 = vmatmul.f32.gmra.mxu0 %v99_v24 }
 0x2d1   :  { %583 = vmatmul.f32.gmra.mxu2 %v354_v60 }
 0x334   :  { %v376_v63 = vpop.f32.mrf.mxu2 }
 0x335   :  { %v379_v0 = vadd.f32 %v376_v63, %v150_v62 }
 0x337   :  { %v632_v2 = vmul.f32 -1.442695, %v379_v0 }
 0x339   :  { %662 = vpow2.f32 %v632_v2 }
 0x33c   :  { %v575_v4 = vpop.f32.mrf.mxu2 }
 0x33d   :  { %v576_v52 = vadd.f32 %v1054_v3, %v575_v4 }
 0x33f   :  { %v663_v5 = vpop.eup %662  ;;  %599 = vst [vmem:[#allocation12] sm:$0xff] %v576_v52 }
 0x340   :  { %v383_v6 = vadd.f32 1.0, %v663_v5 }
 0x342   :  { %664 = vrcp.f32 %v383_v6  ;;  %v395_v13 = vand.u32 2147483648, %v383_v6  ;;  %v393_v16 = vand.u32 2147483647, %v383_v6  ;;  %vm389_vm1 = vweird.f32 %v383_v6 }
 0x344   :  { %v578_v7 = vpop.f32.mrf.mxu2  ;;  %v396_v18 = vor.u32 1.1754944e-38, %v395_v13  ;;  %vm394_vm3 = vcmp.eq.f32.partialorder %v393_v16, 8.507059e+37 }
 0x345   :  { %v579_v8 = vadd.f32 %v1054_v3, %v578_v7 }
 0x347   :  { %600 = vst [vmem:[#allocation12 + $0x8] sm:$0xff] %v579_v8  ;;  %v158_v46 = vpop.f32.mrf.mxu0 }
 0x348   :  { %v665_v9 = vpop.eup %664  ;;  %v159_v2 = vadd.f32 %v1020_v34, %v158_v46 }
 0x349   :  { %v385_v10 = vmul.f32 %v665_v9, %v383_v6  ;;  %vm390_vm0 = vweird.f32 %v665_v9 }
 0x34a   :  { %vm391_vm2 = vmor %vm389_vm1, %vm390_vm0 }
 0x34b   :  { %v386_v11 = vsub.f32 1.0, %v385_v10 }
 0x34c   :  { %v581_v12 = vpop.f32.mrf.mxu2 }
 0x34d   :  { %v582_v14 = vadd.f32 %v1054_v3, %v581_v12  ;;  %v387_v15 = vmul.f32 %v665_v9, %v386_v11 }
 0x34f   :  { %601 = vst [vmem:[#allocation12 + $0x10] sm:$0xff] %v582_v14  ;;  %v388_v17 = vadd.f32 %v665_v9, %v387_v15 }
 0x351   :  { %v392_v19 = vsel %vm391_vm2, %v665_v9, %v388_v17 }
 0x352   :  { %v397_v20 = vsel %vm394_vm3, %v396_v18, %v392_v19 }
 0x353   :  { %418 = vmatmul.f32.vlgmr.msra.gmra.mxu3 %v397_v20  ;;  %586 = vmatmul.f32.gmra.mxu2 %v397_v20 }
 0x354   :  { %v584_v21 = vpop.f32.mrf.mxu2 }
 0x355   :  { %v585_v22 = vadd.f32 %v1054_v3, %v584_v21 }
 0x357   :  { %602 = vst [vmem:[#allocation12 + $0x18] sm:$0xff] %v585_v22 }
 0x3d6   :  { %v419_v27 = vpop.f32.mrf.mxu3  ;;  %v587_v28 = vpop.f32.mrf.mxu2 }
 0x3d7   :  { %v422_v29 = vadd.f32 %v419_v27, %v153_v26  ;;  %v588_v30 = vadd.f32 %v1054_v3, %v587_v28 }
 0x3d9   :  { %v633_v31 = vmul.f32 -1.442695, %v422_v29  ;;  %603 = vst [vmem:[#allocation12 + $0x20] sm:$0xff] %v588_v30 }
 0x3db   :  { %666 = vpow2.f32 %v633_v31 }
 0x3e1   :  { %v667_v32 = vpop.eup %666 }
 0x3e2   :  { %v426_v33 = vadd.f32 1.0, %v667_v32 }
 0x3e4   :  { %668 = vrcp.f32 %v426_v33  ;;  %v438_v38 = vand.u32 2147483648, %v426_v33  ;;  %v436_v40 = vand.u32 2147483647, %v426_v33  ;;  %vm432_vm5 = vweird.f32 %v426_v33 }
 0x3e6   :  { %v439_v42 = vor.u32 1.1754944e-38, %v438_v38  ;;  %vm437_vm7 = vcmp.eq.f32.partialorder %v436_v40, 8.507059e+37 }
 0x3ea   :  { %v669_v35 = vpop.eup %668 }
 0x3eb   :  { %v428_v36 = vmul.f32 %v669_v35, %v426_v33  ;;  %vm433_vm4 = vweird.f32 %v669_v35 }
 0x3ec   :  { %vm434_vm6 = vmor %vm432_vm5, %vm433_vm4 }
 0x3ed   :  { %v429_v37 = vsub.f32 1.0, %v428_v36 }
 0x3ef   :  { %v430_v39 = vmul.f32 %v669_v35, %v429_v37 }
 0x3f1   :  { %v431_v41 = vadd.f32 %v669_v35, %v430_v39 }
 0x3f3   :  { %v435_v43 = vsel %vm434_vm6, %v669_v35, %v431_v41 }
 0x3f4   :  { %v440_v44 = vsel %vm437_vm7, %v439_v42, %v435_v43 }
 0x3f5   :  { %461 = vmatmul.f32.vlgmr.msrb.gmra.mxu0 %v440_v44  ;;  %589 = vmatmul.f32.gmra.mxu2 %v440_v44 }
 0x472   :  { %v462_v48 = vpop.f32.mrf.mxu0 }
 0x473   :  { %v465_v49 = vadd.f32 %v462_v48, %v156_v47 }
 0x475   :  { %v634_v50 = vmul.f32 -1.442695, %v465_v49 }
 0x477   :  { %670 = vpow2.f32 %v634_v50 }
 0x478   :  { %v590_v51 = vpop.f32.mrf.mxu2 }
 0x479   :  { %v591_v53 = vadd.f32 %v1054_v3, %v590_v51 }
 0x47b   :  { %604 = vst [vmem:[#allocation12 + $0x28] sm:$0xff] %v591_v53 }
 0x47d   :  { %v671_v54 = vpop.eup %670 }
 0x47e   :  { %v469_v55 = vadd.f32 1.0, %v671_v54 }
 0x480   :  { %672 = vrcp.f32 %v469_v55  ;;  %v481_v59 = vand.u32 2147483648, %v469_v55  ;;  %v479_v61 = vand.u32 2147483647, %v469_v55  ;;  %vm475_vm9 = vweird.f32 %v469_v55 }
 0x482   :  { %v482_v63 = vor.u32 1.1754944e-38, %v481_v59  ;;  %vm480_vm11 = vcmp.eq.f32.partialorder %v479_v61, 8.507059e+37 }
 0x486   :  { %v673_v56 = vpop.eup %672 }
 0x487   :  { %v471_v57 = vmul.f32 %v673_v56, %v469_v55  ;;  %vm476_vm8 = vweird.f32 %v673_v56 }
 0x488   :  { %vm477_vm10 = vmor %vm475_vm9, %vm476_vm8 }
 0x489   :  { %v472_v58 = vsub.f32 1.0, %v471_v57 }
 0x48b   :  { %v473_v60 = vmul.f32 %v673_v56, %v472_v58 }
 0x48d   :  { %v474_v62 = vadd.f32 %v673_v56, %v473_v60 }
 0x48f   :  { %v478_v0 = vsel %vm477_vm10, %v673_v56, %v474_v62 }
 0x490   :  { %v483_v1 = vsel %vm480_vm11, %v482_v63, %v478_v0 }
 0x491   :  { %504 = vmatmul.f32.vlgmr.msra.gmra.mxu1 %v483_v1  ;;  %592 = vmatmul.f32.gmra.mxu2 %v483_v1 }
 0x50e   :  { %v505_v4 = vpop.f32.mrf.mxu1 }
 0x50f   :  { %v508_v52 = vadd.f32 %v505_v4, %v159_v2 }
 0x511   :  { %v635_v5 = vmul.f32 -1.442695, %v508_v52 }
 0x513   :  { %674 = vpow2.f32 %v635_v5 }
 0x514   :  { %v593_v6 = vpop.f32.mrf.mxu2 }
 0x515   :  { %v594_v7 = vadd.f32 %v1054_v3, %v593_v6 }
 0x517   :  { %605 = vst [vmem:[#allocation12 + $0x30] sm:$0xff] %v594_v7 }
 0x519   :  { %v675_v8 = vpop.eup %674 }
 0x51a   :  { %v512_v9 = vadd.f32 1.0, %v675_v8 }
 0x51c   :  { %676 = vrcp.f32 %v512_v9  ;;  %v524_v13 = vand.u32 2147483648, %v512_v9  ;;  %v522_v15 = vand.u32 2147483647, %v512_v9  ;;  %vm518_vm13 = vweird.f32 %v512_v9 }
 0x51e   :  { %v525_v34 = vor.u32 1.1754944e-38, %v524_v13  ;;  %vm523_vm15 = vcmp.eq.f32.partialorder %v522_v15, 8.507059e+37 }
 0x522   :  { %v677_v10 = vpop.eup %676 }
 0x523   :  { %v514_v11 = vmul.f32 %v677_v10, %v512_v9  ;;  %vm519_vm12 = vweird.f32 %v677_v10 }
 0x524   :  { %vm520_vm14 = vmor %vm518_vm13, %vm519_vm12 }
 0x525   :  { %v515_v12 = vsub.f32 1.0, %v514_v11 }
 0x527   :  { %v516_v14 = vmul.f32 %v677_v10, %v515_v12 }
 0x529   :  { %v517_v16 = vadd.f32 %v677_v10, %v516_v14 }
 0x52b   :  { %v521_v17 = vsel %vm520_vm14, %v677_v10, %v517_v16 }
 0x52c   :  { %v526_v18 = vsel %vm523_vm15, %v525_v34, %v521_v17 }
 0x52d   :  { %595 = vmatmul.f32.gmra.mxu2 %v526_v18 }
 0x5b0   :  { %v596_v19 = vpop.f32.mrf.mxu2 }
 0x5b1   :  { %v597_v20 = vadd.f32 %v1054_v3, %v596_v19 }
 0x5b3   :  { %606 = vst [vmem:[#allocation12 + $0x38] sm:$0xff] %v597_v20 }
 0x5b4   :  { %619 = dma.vmem_to_hbm [thread:$0]  %s612_s18, 1024, %s614_s21, [#allocation6], %s807_s29, %s807_s29, %s808_s30  }
 0x5b5   :  { %804 = dma.done.wait [#allocation6], 1024  }
 0x5b6   :  { %805 = vsyncadd [#allocation6], 4294966272 }
 0x5b7   :  { %624 = vsyncpa [#allocation5], 1 }
 0x5b8   :  { %625 = vsyncpa [#allocation8], 1 }
 0x5b9   :  { %626 = vsyncpa [#allocation11], 1 }
 0x5ba   :  { %627 = vsyncpa [#allocation6], 1 }

</bundles_post_ra>
